<compile_context>
chip_gen: v7x
topology: tpu7x:2x2x1
jax: 0.10.0
libtpu: 0.0.40
codegen_flags: <defaults>
</compile_context>

<pallas_src>
import jax
import jax.numpy as jnp
import numpy as np
from jax.experimental import pallas as pl
from jax.experimental.pallas import tpu as pltpu

EPS = 1e-5          # PyTorch LayerNorm default eps
NEG_SLOPE = 0.01    # PyTorch nn.LeakyReLU default slope


def _layernorm_1pass(h, gamma, beta):
    # Single-pass statistics: mean and E[h^2] together, var = E[h^2] - mean^2.
    mu = jnp.mean(h, axis=-1, keepdims=True)
    ms = jnp.mean(h * h, axis=-1, keepdims=True)
    var = ms - mu * mu
    return (h - mu) * jax.lax.rsqrt(var + EPS) * gamma + beta


def _leaky_relu(h):
    return jnp.maximum(h, NEG_SLOPE * h)


def disc_kernel(lhs_ref, w1_ref, p1_ref, w2_ref, p2_ref, p3_ref, o_ref):
    # fc1 -> LayerNorm(256) -> LeakyReLU   (bf16 MXU operands, f32 accumulate)
    h1 = jnp.dot(lhs_ref[...], w1_ref[...],
                 preferred_element_type=jnp.float32) + p1_ref[0:1, :]
    h1 = _leaky_relu(_layernorm_1pass(h1, p1_ref[1:2, :], p1_ref[2:3, :]))

    # fc2 -> dropout -> LayerNorm(128) -> LeakyReLU
    # TODO(synk): dropout(p=0.4) implemented as eval-mode identity; training
    # parity would need pltpu.prng_seed + prng_random_bits masking with 1/(1-p).
    h2 = jnp.dot(h1.astype(jnp.bfloat16), w2_ref[...],
                 preferred_element_type=jnp.float32) + p2_ref[0:1, :]
    h2 = _leaky_relu(_layernorm_1pass(h2, p2_ref[1:2, :], p2_ref[2:3, :]))

    # fc3 (128 -> 1): VPU multiply + lane reduction (f32) instead of an N=1
    # MXU matmul.  (TB, 1) output -> masked partial stores (only 4 B/row).
    w3 = p3_ref[0:1, :]
    b3 = p3_ref[1:2, :][:, 0:1]
    o_ref[...] = jnp.sum(h2 * w3, axis=-1, keepdims=True) + b3


def _round_up(a, m):
    return (a + m - 1) // m * m


def _default_tb():
    # Generation-tuned default batch tile (review: 4096 on v6e, ~2048 on
    # v5e / v7x).  Pure heuristic; falls back to the safe 2048 everywhere.
    try:
        kind = jax.devices()[0].device_kind.lower()
    except Exception:
        return 2048
    if "v6" in kind:
        return 4096
    return 2048


def discriminator_condition_dot(x, cond, params, tb=None):
    """x: (B, input_dim), cond: (B, 9) -> (B, 1)."""
    B, D = x.shape
    f32 = jnp.float32
    x = x.astype(f32)
    cond = cond.astype(f32)
    K1 = D + 18

    # fc1 LHS built host-side (fuses into upstream XLA producers): the
    # row-wise 3x3 "diagonal(bmm)" dot-product is absorbed into the fc1 matmul
    # via extra columns cond * x[:, :9]; W1cat repeats each dot-weight row 3x.
    lhs = jnp.concatenate([x, cond, cond * x[:, :9]],
                          axis=-1).astype(jnp.bfloat16)            # (B, D+18)

    # Folded / packed parameters (matmul weights bf16, epilogue params f32).
    w1cat = jnp.concatenate(
        [params["w1x"], params["w1c"], jnp.repeat(params["w1d"], 3, axis=0)],
        axis=0).astype(jnp.bfloat16)                               # (D+18, 256)
    p1 = jnp.concatenate([params["b1"], params["g1"], params["be1"]],
                         axis=0).astype(f32)                       # (3, 256)
    w2 = params["w2"].astype(jnp.bfloat16)                         # (256, 128)
    p2 = jnp.concatenate([params["b2"], params["g2"], params["be2"]],
                         axis=0).astype(f32)                       # (3, 128)
    p3 = jnp.concatenate(
        [params["w3"].reshape(1, -1),
         jnp.broadcast_to(params["b3"].reshape(1, 1), (1, 128))],
        axis=0).astype(f32)                                        # (2, 128)

    # Batch tiling: TB multiple of 16 (bf16 sublane packing); when B is large,
    # cap TB at ceil(B/2) so the grid has >= 2 steps and both v7x TensorCores
    # get work under dimension_semantics=("parallel",).
    if tb is None:
        tb = _default_tb()
    tb = max(16, (int(tb) // 16) * 16)
    TB = max(16, min(tb, _round_up(-(-B // 2), 16)))
    Bp = _round_up(B, TB)
    if Bp != B:
        # Padded zero rows pass through LayerNorm safely (var + eps > 0).
        lhs = jnp.pad(lhs, ((0, Bp - B), (0, 0)))
    grid = (Bp // TB,)

    weights = (w1cat, p1, w2, p2, p3)
    weight_specs = [pl.BlockSpec(w.shape, lambda i: (0, 0)) for w in weights]

    flops = 2 * Bp * (K1 * 256 + 256 * 128 + 128)
    bytes_accessed = (Bp * K1 * 2                       # lhs (bf16)
                      + w1cat.size * 2 + w2.size * 2    # bf16 weights
                      + (p1.size + p2.size + p3.size) * 4
                      + Bp * 4)                         # output

    out = pl.pallas_call(
        disc_kernel,
        out_shape=jax.ShapeDtypeStruct((Bp, 1), f32),
        grid=grid,
        in_specs=[pl.BlockSpec((TB, K1), lambda i: (i, 0))] + weight_specs,
        out_specs=pl.BlockSpec((TB, 1), lambda i: (i, 0)),
        compiler_params=pltpu.CompilerParams(
            dimension_semantics=("parallel",)),   # shard batch across TCs (v7x)
        cost_estimate=pl.CostEstimate(flops=flops,
                                      transcendentals=2 * Bp,
                                      bytes_accessed=bytes_accessed),
    )(lhs, *weights)
    return out[:B]


def make_params(key, input_dim):
    """Synthetic parameters matching the module's shapes (args.num_branch = 12):
    fc1: Linear(input_dim + 12, 256) split into x / cond(9) / dot(3) rows,
    fc2: Linear(256, 128), fc3: Linear(128, 1), LayerNorm(256), LayerNorm(128)."""
    ks = jax.random.split(key, 12)
    scale = 0.05
    return {
        "w1x": scale * jax.random.normal(ks[0], (input_dim, 256), jnp.float32),
        "w1c": scale * jax.random.normal(ks[1], (9, 256), jnp.float32),
        "w1d": scale * jax.random.normal(ks[2], (3, 256), jnp.float32),
        "b1": 0.1 * jax.random.normal(ks[3], (1, 256), jnp.float32),
        "g1": 1.0 + 0.1 * jax.random.normal(ks[4], (1, 256), jnp.float32),
        "be1": 0.1 * jax.random.normal(ks[5], (1, 256), jnp.float32),
        "w2": scale * jax.random.normal(ks[6], (256, 128), jnp.float32),
        "b2": 0.1 * jax.random.normal(ks[7], (1, 128), jnp.float32),
        "g2": 1.0 + 0.1 * jax.random.normal(ks[8], (1, 128), jnp.float32),
        "be2": 0.1 * jax.random.normal(ks[9], (1, 128), jnp.float32),
        "w3": scale * jax.random.normal(ks[10], (128, 1), jnp.float32),
        "b3": 0.1 * jnp.ones((1, 1), jnp.float32),
    }


def _layernorm_ref(h, gamma, beta):
    mu = jnp.mean(h, axis=-1, keepdims=True)
    var = jnp.mean((h - mu) ** 2, axis=-1, keepdims=True)   # biased var, like PyTorch
    return (h - mu) * jax.lax.rsqrt(var + EPS) * gamma + beta


def reference(x, cond, p):
    """Pure-JAX f32 reference mirroring the PyTorch forward (eval mode)."""
    B = x.shape[0]
    C = cond.reshape(B, 3, 3)
    S = x[:, :9].reshape(B, 3, 3)
    dot = jnp.einsum("bik,bik->bi", C, S)                   # diag(C @ S^T)
    W1 = jnp.concatenate([p["w1x"], p["w1c"], p["w1d"]], axis=0)
    h = jnp.concatenate([x, cond, dot], axis=1) @ W1 + p["b1"]
    h = _leaky_relu(_layernorm_ref(h, p["g1"], p["be1"]))
    h = h @ p["w2"] + p["b2"]
    h = _leaky_relu(_layernorm_ref(h, p["g2"], p["be2"]))
    return h @ p["w3"] + p["b3"]


if __name__ == "__main__":
    input_dim = 16
    key = jax.random.PRNGKey(0)
    kp, k1, k2, k3, k4 = jax.random.split(key, 5)
    params = make_params(kp, input_dim)

    # Kernel uses bf16 MXU operands (f32 accumulate), so compare against the
    # f32 reference with a correspondingly loosened tolerance.
    TOL = dict(rtol=2e-2, atol=2e-2)

    # Case 1: small batch, single (padded) tile.
    B = 6
    x = jax.random.normal(k1, (B, input_dim), jnp.float32)
    cond = jax.random.normal(k2, (B, 9), jnp.float32)
    out = jax.block_until_ready(discriminator_condition_dot(x, cond, params))
    assert out.shape == (B, 1)
    np.testing.assert_allclose(np.asarray(out),
                               np.asarray(reference(x, cond, params)), **TOL)

    # Case 2: batch larger than the tile -> multi-step grid + tail padding.
    B2 = 40
    x2 = jax.random.normal(k3, (B2, input_dim), jnp.float32)
    cond2 = jax.random.normal(k4, (B2, 9), jnp.float32)
    out2 = jax.block_until_ready(
        discriminator_condition_dot(x2, cond2, params, tb=16))
    assert out2.shape == (B2, 1)
    np.testing.assert_allclose(np.asarray(out2),
                               np.asarray(reference(x2, cond2, params)), **TOL)

    print("KERNEL_OK")
</pallas_src>

<mosaic_0001>
module attributes {stable_mosaic.version = 11 : i64} {
  func.func @disc_kernel(%arg0: i32, %arg1: memref<16x34xbf16, #tpu.memory_space<vmem>>, %arg2: memref<34x256xbf16, #tpu.memory_space<vmem>>, %arg3: memref<3x256xf32, #tpu.memory_space<vmem>>, %arg4: memref<256x128xbf16, #tpu.memory_space<vmem>>, %arg5: memref<3x128xf32, #tpu.memory_space<vmem>>, %arg6: memref<2x128xf32, #tpu.memory_space<vmem>>, %arg7: memref<16x1xf32, #tpu.memory_space<vmem>>) attributes {dimension_semantics = [#tpu.dimension_semantics<parallel>], iteration_bounds = array<i64: 1>, scalar_prefetch = 0 : i64, scratch_operands = 0 : i64, tpu.core_type = #tpu.core_type<tc>, window_params = [{transform_indices = @transform_0, window_bounds = array<i64: 16, 34>}, {pipeline_mode = #tpu.pipeline_mode<synchronous>, transform_indices = @transform_1, window_bounds = array<i64: 34, 256>}, {pipeline_mode = #tpu.pipeline_mode<synchronous>, transform_indices = @transform_2, window_bounds = array<i64: 3, 256>}, {pipeline_mode = #tpu.pipeline_mode<synchronous>, transform_indices = @transform_3, window_bounds = array<i64: 256, 128>}, {pipeline_mode = #tpu.pipeline_mode<synchronous>, transform_indices = @transform_4, window_bounds = array<i64: 3, 128>}, {pipeline_mode = #tpu.pipeline_mode<synchronous>, transform_indices = @transform_5, window_bounds = array<i64: 2, 128>}, {transform_indices = @transform_6, window_bounds = array<i64: 16, 1>}]} {
    %c0 = arith.constant 0 : index
    %c0_0 = arith.constant 0 : index
    %0 = vector.load %arg1[%c0, %c0_0] : memref<16x34xbf16, #tpu.memory_space<vmem>>, vector<16x34xbf16>
    %c0_1 = arith.constant 0 : index
    %c0_2 = arith.constant 0 : index
    %1 = vector.load %arg2[%c0_1, %c0_2] : memref<34x256xbf16, #tpu.memory_space<vmem>>, vector<34x256xbf16>
    %cst = arith.constant dense<0.000000e+00> : vector<16x256xf32>
    %2 = tpu.matmul %0, %1, %cst {dimension_numbers = #tpu.dot_dimension_numbers<[1], [0], [0], [1], [0, 0, 1, 1], [], []>} : vector<16x34xbf16>, vector<34x256xbf16>, vector<16x256xf32> -> vector<16x256xf32>
    %c0_3 = arith.constant 0 : index
    %c0_4 = arith.constant 0 : index
    %3 = vector.load %arg3[%c0_3, %c0_4] : memref<3x256xf32, #tpu.memory_space<vmem>>, vector<1x256xf32>
    %4 = vector.broadcast %3 : vector<1x256xf32> to vector<16x256xf32>
    %5 = arith.addf %2, %4 : vector<16x256xf32>
    %c1 = arith.constant 1 : index
    %c0_5 = arith.constant 0 : index
    %6 = vector.load %arg3[%c1, %c0_5] : memref<3x256xf32, #tpu.memory_space<vmem>>, vector<1x256xf32>
    %c2 = arith.constant 2 : index
    %c0_6 = arith.constant 0 : index
    %7 = vector.load %arg3[%c2, %c0_6] : memref<3x256xf32, #tpu.memory_space<vmem>>, vector<1x256xf32>
    %cst_7 = arith.constant dense<0.000000e+00> : vector<16xf32>
    %8 = vector.multi_reduction <add>, %5, %cst_7 [1] : vector<16x256xf32> to vector<16xf32>
    %9 = vector.shape_cast %8 : vector<16xf32> to vector<16x1xf32>
    %cst_8 = arith.constant 2.560000e+02 : f32
    %10 = vector.broadcast %cst_8 : f32 to vector<16x1xf32>
    %11 = arith.divf %9, %10 : vector<16x1xf32>
    %12 = arith.mulf %5, %5 : vector<16x256xf32>
    %cst_9 = arith.constant dense<0.000000e+00> : vector<16xf32>
    %13 = vector.multi_reduction <add>, %12, %cst_9 [1] : vector<16x256xf32> to vector<16xf32>
    %14 = vector.shape_cast %13 : vector<16xf32> to vector<16x1xf32>
    %cst_10 = arith.constant 2.560000e+02 : f32
    %15 = vector.broadcast %cst_10 : f32 to vector<16x1xf32>
    %16 = arith.divf %14, %15 : vector<16x1xf32>
    %17 = arith.mulf %11, %11 : vector<16x1xf32>
    %18 = arith.subf %16, %17 : vector<16x1xf32>
    %19 = vector.broadcast %11 : vector<16x1xf32> to vector<16x256xf32>
    %20 = arith.subf %5, %19 : vector<16x256xf32>
    %cst_11 = arith.constant 9.99999974E-6 : f32
    %21 = vector.broadcast %cst_11 : f32 to vector<16x1xf32>
    %22 = arith.addf %18, %21 : vector<16x1xf32>
    %23 = math.rsqrt %22 : vector<16x1xf32>
    %24 = vector.broadcast %23 : vector<16x1xf32> to vector<16x256xf32>
    %25 = arith.mulf %20, %24 : vector<16x256xf32>
    %26 = vector.broadcast %6 : vector<1x256xf32> to vector<16x256xf32>
    %27 = arith.mulf %25, %26 : vector<16x256xf32>
    %28 = vector.broadcast %7 : vector<1x256xf32> to vector<16x256xf32>
    %29 = arith.addf %27, %28 : vector<16x256xf32>
    %cst_12 = arith.constant 0.00999999977 : f32
    %30 = vector.broadcast %cst_12 : f32 to vector<16x256xf32>
    %31 = arith.mulf %30, %29 : vector<16x256xf32>
    %32 = arith.maximumf %29, %31 : vector<16x256xf32>
    %33 = arith.truncf %32 : vector<16x256xf32> to vector<16x256xbf16>
    %c0_13 = arith.constant 0 : index
    %c0_14 = arith.constant 0 : index
    %34 = vector.load %arg4[%c0_13, %c0_14] : memref<256x128xbf16, #tpu.memory_space<vmem>>, vector<256x128xbf16>
    %cst_15 = arith.constant dense<0.000000e+00> : vector<16x128xf32>
    %35 = tpu.matmul %33, %34, %cst_15 {dimension_numbers = #tpu.dot_dimension_numbers<[1], [0], [0], [1], [0, 0, 1, 1], [], []>} : vector<16x256xbf16>, vector<256x128xbf16>, vector<16x128xf32> -> vector<16x128xf32>
    %c0_16 = arith.constant 0 : index
    %c0_17 = arith.constant 0 : index
    %36 = vector.load %arg5[%c0_16, %c0_17] : memref<3x128xf32, #tpu.memory_space<vmem>>, vector<1x128xf32>
    %37 = vector.broadcast %36 : vector<1x128xf32> to vector<16x128xf32>
    %38 = arith.addf %35, %37 : vector<16x128xf32>
    %c1_18 = arith.constant 1 : index
    %c0_19 = arith.constant 0 : index
    %39 = vector.load %arg5[%c1_18, %c0_19] : memref<3x128xf32, #tpu.memory_space<vmem>>, vector<1x128xf32>
    %c2_20 = arith.constant 2 : index
    %c0_21 = arith.constant 0 : index
    %40 = vector.load %arg5[%c2_20, %c0_21] : memref<3x128xf32, #tpu.memory_space<vmem>>, vector<1x128xf32>
    %cst_22 = arith.constant dense<0.000000e+00> : vector<16xf32>
    %41 = vector.multi_reduction <add>, %38, %cst_22 [1] : vector<16x128xf32> to vector<16xf32>
    %42 = vector.shape_cast %41 : vector<16xf32> to vector<16x1xf32>
    %cst_23 = arith.constant 1.280000e+02 : f32
    %43 = vector.broadcast %cst_23 : f32 to vector<16x1xf32>
    %44 = arith.divf %42, %43 : vector<16x1xf32>
    %45 = arith.mulf %38, %38 : vector<16x128xf32>
    %cst_24 = arith.constant dense<0.000000e+00> : vector<16xf32>
    %46 = vector.multi_reduction <add>, %45, %cst_24 [1] : vector<16x128xf32> to vector<16xf32>
    %47 = vector.shape_cast %46 : vector<16xf32> to vector<16x1xf32>
    %cst_25 = arith.constant 1.280000e+02 : f32
    %48 = vector.broadcast %cst_25 : f32 to vector<16x1xf32>
    %49 = arith.divf %47, %48 : vector<16x1xf32>
    %50 = arith.mulf %44, %44 : vector<16x1xf32>
    %51 = arith.subf %49, %50 : vector<16x1xf32>
    %52 = vector.broadcast %44 : vector<16x1xf32> to vector<16x128xf32>
    %53 = arith.subf %38, %52 : vector<16x128xf32>
    %cst_26 = arith.constant 9.99999974E-6 : f32
    %54 = vector.broadcast %cst_26 : f32 to vector<16x1xf32>
    %55 = arith.addf %51, %54 : vector<16x1xf32>
    %56 = math.rsqrt %55 : vector<16x1xf32>
    %57 = vector.broadcast %56 : vector<16x1xf32> to vector<16x128xf32>
    %58 = arith.mulf %53, %57 : vector<16x128xf32>
    %59 = vector.broadcast %39 : vector<1x128xf32> to vector<16x128xf32>
    %60 = arith.mulf %58, %59 : vector<16x128xf32>
    %61 = vector.broadcast %40 : vector<1x128xf32> to vector<16x128xf32>
    %62 = arith.addf %60, %61 : vector<16x128xf32>
    %cst_27 = arith.constant 0.00999999977 : f32
    %63 = vector.broadcast %cst_27 : f32 to vector<16x128xf32>
    %64 = arith.mulf %63, %62 : vector<16x128xf32>
    %65 = arith.maximumf %62, %64 : vector<16x128xf32>
    %c0_28 = arith.constant 0 : index
    %c0_29 = arith.constant 0 : index
    %66 = vector.load %arg6[%c0_28, %c0_29] : memref<2x128xf32, #tpu.memory_space<vmem>>, vector<1x128xf32>
    %c1_30 = arith.constant 1 : index
    %c0_31 = arith.constant 0 : index
    %67 = vector.load %arg6[%c1_30, %c0_31] : memref<2x128xf32, #tpu.memory_space<vmem>>, vector<1x128xf32>
    %68 = vector.extract_strided_slice %67 {offsets = [0, 0], sizes = [1, 1], strides = [1, 1]} : vector<1x128xf32> to vector<1x1xf32>
    %69 = vector.broadcast %66 : vector<1x128xf32> to vector<16x128xf32>
    %70 = arith.mulf %65, %69 : vector<16x128xf32>
    %cst_32 = arith.constant dense<0.000000e+00> : vector<16xf32>
    %71 = vector.multi_reduction <add>, %70, %cst_32 [1] : vector<16x128xf32> to vector<16xf32>
    %72 = vector.shape_cast %71 : vector<16xf32> to vector<16x1xf32>
    %73 = vector.broadcast %68 : vector<1x1xf32> to vector<16x1xf32>
    %74 = arith.addf %72, %73 : vector<16x1xf32>
    %c0_33 = arith.constant 0 : index
    %c0_34 = arith.constant 0 : index
    %75 = vector.load %arg7[%c0_33, %c0_34] : memref<16x1xf32, #tpu.memory_space<vmem>>, vector<16x1xf32>
    tpu.vector_store %arg7[%c0_33, %c0_34], %74 {strides = array<i32>} : memref<16x1xf32, #tpu.memory_space<vmem>>, vector<16x1xf32>,
    return
  }
  func.func @transform_0(%arg0: i32) -> (i32, i32) {
    %c0_i32 = arith.constant 0 : i32
    %c0_i32_0 = arith.constant 0 : i32
    return %arg0, %c0_i32 : i32, i32
  }
  func.func @transform_1(%arg0: i32) -> (i32, i32) {
    %c0_i32 = arith.constant 0 : i32
    %c0_i32_0 = arith.constant 0 : i32
    %c0_i32_1 = arith.constant 0 : i32
    return %c0_i32, %c0_i32_0 : i32, i32
  }
  func.func @transform_2(%arg0: i32) -> (i32, i32) {
    %c0_i32 = arith.constant 0 : i32
    %c0_i32_0 = arith.constant 0 : i32
    %c0_i32_1 = arith.constant 0 : i32
    return %c0_i32, %c0_i32_0 : i32, i32
  }
  func.func @transform_3(%arg0: i32) -> (i32, i32) {
    %c0_i32 = arith.constant 0 : i32
    %c0_i32_0 = arith.constant 0 : i32
    %c0_i32_1 = arith.constant 0 : i32
    return %c0_i32, %c0_i32_0 : i32, i32
  }
  func.func @transform_4(%arg0: i32) -> (i32, i32) {
    %c0_i32 = arith.constant 0 : i32
    %c0_i32_0 = arith.constant 0 : i32
    %c0_i32_1 = arith.constant 0 : i32
    return %c0_i32, %c0_i32_0 : i32, i32
  }
  func.func @transform_5(%arg0: i32) -> (i32, i32) {
    %c0_i32 = arith.constant 0 : i32
    %c0_i32_0 = arith.constant 0 : i32
    %c0_i32_1 = arith.constant 0 : i32
    return %c0_i32, %c0_i32_0 : i32, i32
  }
  func.func @transform_6(%arg0: i32) -> (i32, i32) {
    %c0_i32 = arith.constant 0 : i32
    %c0_i32_0 = arith.constant 0 : i32
    return %arg0, %c0_i32 : i32, i32
  }
}

</mosaic_0001>

<bundles_post_ra>
// kernel: tpu_custom_call.1
= control target key start
LH: loop header
LB: loop body
LE: loop exit
PB: predicated region body
PF: predicated region fallthrough
CT: control target
= control target key end

     0   :  { %11 = vsyncpa [#allocation3], 0  ;;  %s856_s0 = inlined_call_operand.hbm [shape: bf16[16,34], index: 0, kind: input, shape index: {}]   ;;  %s857_s1 = inlined_call_operand.hbm [shape: bf16[34,256], index: 1, kind: input, shape index: {}]   ;;  %s858_s2 = inlined_call_operand.hbm [shape: f32[3,256], index: 2, kind: input, shape index: {}]   ;;  %s859_s3 = inlined_call_operand.hbm [shape: bf16[256,128], index: 3, kind: input, shape index: {}]   ;;  %s860_s4 = inlined_call_operand.vmem [shape: f32[3,128], index: 4, kind: input, shape index: {}]   ;;  %s861_s5 = inlined_call_operand.vmem [shape: f32[2,128], index: 5, kind: input, shape index: {}]   ;;  %s862_s6 = inlined_call_operand.vmem [shape: f32[16,1], index: 6, kind: output, shape index: {}]  }
   0x1   :  { %12 = vsyncpa [#allocation5], 0 }
   0x2   :  { %13 = vsyncpa [#allocation8], 0  ;;  %s696_s21 = smov [#allocation4]   ;;  %s602_s25 = scalar_lea.hbm %s857_s1, 640 }
   0x3   :  { %s31_s22 = sshll.u32 %s696_s21, 4  ;;  %p603_p0 = scmp.ne.s32.totalorder %s857_s1, %s602_s25  ;;  %s32_s22 = int_to_ptr.vmem [resolvable:$true] %s31_s22 }
   0x4   :  { %p606_p1 = scmp.lt.u32.totalorder %s602_s25, %s857_s1 }
   0x6   :  { %p608_p2 = pnand %p606_p1, %p603_p0 }
   0x8   :  { %611 = shalt.err (!%p608_p2)
}
   0x9   :  { %s612_s30 = scalar_lea.vmem %s32_s22, 640  ;;  %p617_p4 = scmp.lt.s32.totalorder %s32_s22, %s32_s22 }
   0xa   :  { %p613_p3 = scmp.ne.s32.totalorder %s32_s22, %s612_s30  ;;  %p618_p5 = scmp.lt.s32.totalorder %s612_s30, %s612_s30 }
   0xc   :  { %p619_p6 = por %p618_p5, %p617_p4 }
   0xe   :  { %p620_p7 = pnand %p619_p6, %p613_p3 }
  0x10   :  { %623 = shalt.err (!%p620_p7)
}
  0x11   :  { %s697_s7 = smov 128   ;;  %s698_s8 = smov 8  }
  0x12   :  { %37 = dma.hbm_to_vmem [thread:$0]  %s857_s1, 640, %s32_s22, [#allocation5], %s697_s7, %s697_s7, %s698_s8  }
  0x13   :  { %s699_s11 = smov [#allocation2]   ;;  %s624_s15 = scalar_lea.hbm %s856_s0, 128 }
  0x14   :  { %s19_s12 = sshll.u32 %s699_s11, 4  ;;  %p625_p8 = scmp.ne.s32.totalorder %s856_s0, %s624_s15  ;;  %s20_s12 = int_to_ptr.vmem [resolvable:$true] %s19_s12 }
  0x15   :  { %p628_p9 = scmp.lt.u32.totalorder %s624_s15, %s856_s0 }
  0x17   :  { %p630_p10 = pnand %p628_p9, %p625_p8 }
  0x19   :  { %633 = shalt.err (!%p630_p10)
}
  0x1a   :  { %s634_s20 = scalar_lea.vmem %s20_s12, 128  ;;  %p639_p12 = scmp.lt.s32.totalorder %s20_s12, %s20_s12 }
  0x1b   :  { %p635_p11 = scmp.ne.s32.totalorder %s20_s12, %s634_s20  ;;  %p640_p13 = scmp.lt.s32.totalorder %s634_s20, %s634_s20 }
  0x1d   :  { %p641_p0 = por %p640_p13, %p639_p12 }
  0x1f   :  { %p642_p1 = pnand %p641_p0, %p635_p11 }
  0x21   :  { %645 = shalt.err (!%p642_p1)
}
  0x22   :  { %s700_s1 = smov 64   ;;  %s701_s21 = smov 4  }
  0x23   :  { %25 = dma.hbm_to_vmem [thread:$0]  %s856_s0, 128, %s20_s12, [#allocation3], %s700_s1, %s700_s1, %s701_s21  }
  0x24   :  { %s702_s24 = smov [#allocation6]   ;;  %s703_s26 = smov [#allocation7]  }
  0x25   :  { %s44_s25 = sshll.u32 %s702_s24, 4  ;;  %s53_s27 = sshll.u32 %s703_s26, 4  ;;  %s45_s25 = int_to_ptr.vmem [resolvable:$true] %s44_s25  ;;  %s767_s27 = int_to_ptr.vmem [resolvable:$true] %s53_s27 }
  0x26   :  { %s646_s30 = scalar_lea.hbm %s858_s2, 128 }
  0x27   :  { %p647_p2 = scmp.ne.s32.totalorder %s858_s2, %s646_s30  ;;  %p650_p3 = scmp.lt.u32.totalorder %s646_s30, %s858_s2 }
  0x29   :  { %p652_p4 = pnand %p650_p3, %p647_p2 }
  0x2b   :  { %655 = shalt.err (!%p652_p4)
}
  0x2c   :  { %s656_s0 = scalar_lea.vmem %s45_s25, 128  ;;  %p661_p6 = scmp.lt.s32.totalorder %s45_s25, %s45_s25 }
  0x2d   :  { %p657_p5 = scmp.ne.s32.totalorder %s45_s25, %s656_s0  ;;  %p662_p7 = scmp.lt.s32.totalorder %s656_s0, %s656_s0 }
  0x2f   :  { %p663_p8 = por %p662_p7, %p661_p6 }
  0x31   :  { %p664_p9 = pnand %p663_p8, %p657_p5 }
  0x33   :  { %667 = shalt.err (!%p664_p9)
}
  0x34   :  { %47 = dma.hbm_to_vmem [thread:$0]  %s858_s2, 128, %s45_s25, [#allocation5]  }
  0x35   :  { %s668_s15 = scalar_lea.hbm %s859_s3, 2048 }
  0x36   :  { %p669_p10 = scmp.ne.s32.totalorder %s859_s3, %s668_s15  ;;  %p672_p11 = scmp.lt.u32.totalorder %s668_s15, %s859_s3 }
  0x38   :  { %p674_p12 = pnand %p672_p11, %p669_p10 }
  0x3a   :  { %677 = shalt.err (!%p674_p12)
}
  0x3b   :  { %s678_s20 = scalar_lea.vmem %s767_s27, 2048  ;;  %p683_p0 = scmp.lt.s32.totalorder %s767_s27, %s767_s27 }
  0x3c   :  { %p679_p13 = scmp.ne.s32.totalorder %s767_s27, %s678_s20  ;;  %p684_p1 = scmp.lt.s32.totalorder %s678_s20, %s678_s20 }
  0x3e   :  { %p685_p2 = por %p684_p1, %p683_p0 }
  0x40   :  { %p686_p3 = pnand %p685_p2, %p679_p13 }
  0x42   :  { %689 = shalt.err (!%p686_p3)
}
  0x43   :  { %59 = dma.hbm_to_vmem [thread:$0]  %s859_s3, 2048, %s767_s27, [#allocation8], %s700_s1, %s700_s1, %s701_s21  }
  0x44   :  { %690 = dma.done.wait [#allocation3], 128  }
  0x45   :  { %691 = vsyncadd [#allocation3], 4294967168 }
  0x46   :  { %692 = dma.done.wait [#allocation5], 768  }
  0x47   :  { %693 = vsyncadd [#allocation5], 4294966528 }
  0x48   :  { %694 = dma.done.wait [#allocation8], 2048  }
  0x49   :  { %695 = vsyncadd [#allocation8], 4294965248  ;;  %v704_v0 = vmov 0   ;;  %v569_v1 = vld [vmem:[#allocation4 + $0x4] ss:$8 sps:$4 sm:$0xff]   ;;  %vm130_vm0 = vcmask 1040384   ;;  %v86_v10 = vlaneseq }
  0x4a   :  { %169 = vmatprep.mubr.bf16.mxu0 %v704_v0  ;;  %v571_v2 = vld [vmem:[#allocation4] ss:$8 sps:$4 sm:$0xff]   ;;  %137 = vmatprep.subr.bf16.mxu0 %v569_v1  ;;  %v572_v3 = vld [vmem:[#allocation4 + $0x14] ss:$8 sps:$4 sm:$0xff]   ;;  %v574_v5 = vld [vmem:[#allocation4 + $0x10] ss:$8 sps:$4 sm:$0xff]  }
  0x4b   :  { %v83_v4 = vld [vmem:[#allocation4 + $0x20] sm:$0x11]  ;;  %138 = vmatpush1.bf16.msra.mxu0 %v571_v2  ;;  %vm126_vm1 = vcmask 277504   ;;  %v577_v9 = vld [vmem:[#allocation2] sm:$0xff]   ;;  %v87_v11 = vshrl.u32 %v86_v10, 7  ;;  %v578_v33 = vld [vmem:[#allocation7 + $0x40] sm:$0xff]  }
  0x4c   :  { %v513_v6 = vcombine.low %v83_v4, %v83_v4  ;;  %139 = vmatprep.subr.bf16.mxu0 %v572_v3  ;;  %v514_v7 = vcombine.high %v83_v4, %v83_v4  ;;  %v84_v13 = vld [vmem:[#allocation6] ss:$4 sm:$0x3]  ;;  %v579_v34 = vld [vmem:[#allocation7] sm:$0xff]   ;;  %538 = vmatprep.subr.bf16.mxu1 %v578_v33  ;;  %v580_v35 = vld [vmem:[#allocation7 + $0x48] sm:$0xff]   ;;  %vm498_vm2 = vcmask 7168  }
  0x4d   :  { %v801_v12 = vsub.s32 0, %v87_v11  ;;  %v803_v14 = vsub.s32 1, %v87_v11  ;;  %539 = vmatpush3.bf16.msra.mxu1 %v579_v34  ;;  %v581_v36 = vld [vmem:[#allocation7 + $0x8] sm:$0xff]   ;;  %v582_v37 = vld [vmem:[#allocation7 + $0x50] sm:$0xff]   ;;  %v584_v39 = vld [vmem:[#allocation7 + $0x58] sm:$0xff]  }
  0x4e   :  { %v132_v8 = vsel %vm130_vm0, %v513_v6, 0  ;;  %540 = vmatprep.subr.bf16.mxu1 %v580_v35  ;;  %v583_v38 = vld [vmem:[#allocation7 + $0x10] sm:$0xff]   ;;  %v585_v40 = vld [vmem:[#allocation7 + $0x18] sm:$0xff]   ;;  %v586_v41 = vld [vmem:[#allocation7 + $0x60] sm:$0xff]  }
  0x4f   :  { %140 = vmatpush1.bf16.msra.mxu0 %v574_v5  ;;  %v89_v15 = vrot.slane %v84_v13, %v801_v12  ;;  %v93_v16 = vrot.slane %v84_v13, %v803_v14  ;;  %v587_v42 = vld [vmem:[#allocation7 + $0x20] sm:$0xff]   ;;  %v588_v43 = vld [vmem:[#allocation7 + $0x68] sm:$0xff]   ;;  %v590_v45 = vld [vmem:[#allocation7 + $0x70] sm:$0xff]  }
  0x50   :  { %515 = vmatprep.subr.msk.bf16.mxu0 %vm130_vm0, %v514_v7  ;;  %v589_v44 = vld [vmem:[#allocation7 + $0x28] sm:$0xff]   ;;  %v591_v46 = vld [vmem:[#allocation7 + $0x30] sm:$0xff]   ;;  %v592_v47 = vld [vmem:[#allocation7 + $0x78] sm:$0xff]  }
  0x51   :  { %541 = vmatpush3.bf16.msra.mxu1 %v581_v36  ;;  %v593_v48 = vld [vmem:[#allocation7 + $0x38] sm:$0xff]   ;;  %v517_v34 = vld [vmem:[%s860_s4] ss:$0 sm:$0xff] }
  0x52   :  { %542 = vmatprep.subr.bf16.mxu1 %v582_v37  ;;  %v181_v63 = vld [vmem:[#allocation6 + $0x1] ss:$4 sm:$0x3]  ;;  %v183_v2 = vld [vmem:[#allocation6 + $0x2] ss:$4 sm:$0x3] }
  0x53   :  { %142 = vmatpush1.bf16.msra.mxu0 %v132_v8  ;;  %v225_v3 = vrot.slane %v181_v63, %v801_v12  ;;  %v229_v4 = vrot.slane %v181_v63, %v803_v14  ;;  %v240_v8 = vrot.slane %v183_v2, %v801_v12 }
  0x55   :  { %543 = vmatpush3.bf16.msra.mxu1 %v583_v38 }
  0x56   :  { %516 = vmatmul.mubr.msk.bf16.vlgmr.msra.gmra.mrb[0].mxu0 %vm126_vm1, %v577_v9  ;;  %544 = vmatprep.subr.bf16.mxu1 %v584_v39  ;;  %v244_v9 = vrot.slane %v183_v2, %v803_v14 }
  0x59   :  { %545 = vmatpush3.bf16.msra.mxu1 %v585_v40 }
  0x5a   :  { %546 = vmatprep.subr.bf16.mxu1 %v586_v41 }
  0x5d   :  { %547 = vmatpush3.bf16.msra.mxu1 %v587_v42 }
  0x5e   :  { %548 = vmatprep.subr.bf16.mxu1 %v588_v43 }
  0x61   :  { %549 = vmatpush3.bf16.msra.mxu1 %v589_v44 }
  0x62   :  { %550 = vmatprep.subr.bf16.mxu1 %v590_v45 }
  0x65   :  { %551 = vmatpush3.bf16.msra.mxu1 %v591_v46 }
  0x66   :  { %552 = vmatprep.subr.bf16.mxu1 %v592_v47 }
  0x69   :  { %553 = vmatpush3.bf16.msra.mxu1 %v593_v48 }
 0x129   :  { %v171_v17 = vpop.f32.mrb[0].mxu0 }
 0x12a   :  { %v807_v18 = vadd.f32 %v171_v17, %v89_v15  ;;  %v173_v19 = vpop.f32.mrb[1].mxu0 }
 0x12b   :  { %v809_v20 = vadd.f32 %v173_v19, %v93_v16  ;;  %v175_v21 = vpop.f32.mrb[2].mxu0 }
 0x12c   :  { %v811_v22 = vadd.f32 %v175_v21, %v89_v15  ;;  %v177_v23 = vpop.f32.mrb[3].mxu0  ;;  %v193_v24 = vmul.f32 %v807_v18, %v807_v18 }
 0x12d   :  { %v815_v25 = vadd.f32 %v177_v23, %v93_v16  ;;  %v184_v26 = vadd.f32 %v809_v20, %v807_v18  ;;  %v194_v27 = vmul.f32 %v809_v20, %v809_v20 }
 0x12e   :  { %v195_v29 = vmul.f32 %v811_v22, %v811_v22 }
 0x12f   :  { %185 = vadd.xlane.f32.xlu0 %v184_v26  ;;  %v197_v28 = vadd.f32 %v194_v27, %v193_v24  ;;  %v196_v30 = vmul.f32 %v815_v25, %v815_v25  ;;  %v187_v31 = vadd.f32 %v815_v25, %v811_v22 }
 0x131   :  { %198 = vadd.xlane.f32.xlu1 %v197_v28  ;;  %v200_v32 = vadd.f32 %v196_v30, %v195_v29 }
 0x133   :  { %188 = vadd.xlane.f32.xlu0 %v187_v31 }
 0x135   :  { %201 = vadd.xlane.f32.xlu1 %v200_v32 }
 0x1bc   :  { %v186_v49 = vpop.xlane.xlu0 %185 }
 0x1bd   :  { %v191_v50 = vmul.f32 0.00390625, %v186_v49 }
 0x1be   :  { %v199_v51 = vpop.xlane.xlu1 %198 }
 0x1bf   :  { %v203_v52 = vmul.f32 0.00390625, %v199_v51  ;;  %v205_v53 = vmul.f32 %v191_v50, %v191_v50  ;;  %v209_v0 = vsub.f32 %v807_v18, %v191_v50  ;;  %v210_v1 = vsub.f32 %v809_v20, %v191_v50 }
 0x1c0   :  { %v189_v54 = vpop.xlane.xlu0 %188 }
 0x1c1   :  { %v207_v55 = vsub.f32 %v203_v52, %v205_v53  ;;  %v192_v56 = vmul.f32 0.00390625, %v189_v54 }
 0x1c2   :  { %v202_v57 = vpop.xlane.xlu1 %201 }
 0x1c3   :  { %v213_v58 = vadd.f32 1e-05, %v207_v55  ;;  %v204_v59 = vmul.f32 0.00390625, %v202_v57  ;;  %v206_v60 = vmul.f32 %v192_v56, %v192_v56  ;;  %v211_v13 = vsub.f32 %v811_v22, %v192_v56 }
 0x1c4   :  { %v212_v15 = vsub.f32 %v815_v25, %v192_v56 }
 0x1c5   :  { %594 = vrsqrt.f32 %v213_v58  ;;  %v208_v61 = vsub.f32 %v204_v59, %v206_v60  ;;  %v534_v60 = vld [vmem:[%s860_s4 + $0x1] ss:$0 sm:$0xff] }
 0x1c7   :  { %v214_v62 = vadd.f32 1e-05, %v208_v61 }
 0x1c9   :  { %596 = vrsqrt.f32 %v214_v62 }
 0x1cf   :  { %v595_v5 = vpop.eup %594 }
 0x1d0   :  { %v218_v6 = vmul.f32 %v595_v5, %v210_v1  ;;  %v217_v7 = vmul.f32 %v595_v5, %v209_v0  ;;  %v535_v0 = vld [vmem:[%s860_s4 + $0x2] ss:$0 sm:$0xff] }
 0x1d2   :  { %v233_v10 = vmul.f32 %v229_v4, %v218_v6  ;;  %v232_v11 = vmul.f32 %v225_v3, %v217_v7  ;;  %v536_v7 = vld [vmem:[%s861_s5] ss:$0 sm:$0xff] }
 0x1d3   :  { %v597_v16 = vpop.eup %596 }
 0x1d4   :  { %v220_v17 = vmul.f32 %v597_v16, %v212_v15  ;;  %v248_v18 = vadd.f32 %v244_v9, %v233_v10  ;;  %v219_v19 = vmul.f32 %v597_v16, %v211_v13  ;;  %v247_v20 = vadd.f32 %v240_v8, %v232_v11  ;;  %v537_v15 = vld [vmem:[%s861_s5 + $0x1] ss:$0 sm:$0xff] }
 0x1d6   :  { %v235_v21 = vmul.f32 %v229_v4, %v220_v17  ;;  %v234_v23 = vmul.f32 %v225_v3, %v219_v19  ;;  %v252_v26 = vmul.f32 0.01, %v248_v18  ;;  %v251_v28 = vmul.f32 0.01, %v247_v20 }
 0x1d8   :  { %v250_v24 = vadd.f32 %v244_v9, %v235_v21  ;;  %v249_v27 = vadd.f32 %v240_v8, %v234_v23  ;;  %v256_v14 = vmax.f32 %v248_v18, %v252_v26  ;;  %v255_v31 = vmax.f32 %v247_v20, %v251_v28 }
 0x1da   :  { %v254_v12 = vmul.f32 0.01, %v250_v24  ;;  %v253_v29 = vmul.f32 0.01, %v249_v27 }
 0x1dc   :  { %v258_v30 = vmax.f32 %v250_v24, %v254_v12  ;;  %v257_v32 = vmax.f32 %v249_v27, %v253_v29 }
 0x1de   :  { %v260_v22 = vpack.c.bf16 %v258_v30, %v256_v14  ;;  %v259_v33 = vpack.c.bf16 %v257_v32, %v255_v31 }
 0x1e0   :  { %426 = vmatprep.mubr.bf16.mxu1 %v260_v22 }
 0x1e1   :  { %427 = vmatmul.mubr.bf16.vlgmr.msra.gmra.mrb[0].mxu1 %v259_v33 }
 0x2b4   :  { %v554_v25 = vpop.f32.mrb[0].mxu1 }
 0x2b5   :  { %v555_v35 = vpop.f32.mrb[1].mxu1 }
 0x2b6   :  { %v556_v36 = vadd.f32 %v555_v35, %v554_v25  ;;  %v557_v37 = vpop.f32.mrb[2].mxu1 }
 0x2b7   :  { %v558_v38 = vpop.f32.mrb[3].mxu1 }
 0x2b8   :  { %v429_v39 = vadd.f32 %v556_v36, %v517_v34  ;;  %v559_v40 = vadd.f32 %v558_v38, %v557_v37 }
 0x2ba   :  { %v432_v41 = vadd.f32 %v559_v40, %v517_v34  ;;  %437 = vadd.xlane.f32.xlu0 %v429_v39  ;;  %v444_v42 = vmul.f32 %v429_v39, %v429_v39 }
 0x2bc   :  { %439 = vadd.xlane.f32.xlu1 %v432_v41  ;;  %v445_v43 = vmul.f32 %v432_v41, %v432_v41 }
 0x2be   :  { %446 = vadd.xlane.f32.xlu0 %v444_v42 }
 0x2c0   :  { %448 = vadd.xlane.f32.xlu1 %v445_v43 }
 0x347   :  { %v438_v44 = vpop.xlane.xlu0 %437 }
 0x348   :  { %v442_v45 = vmul.f32 0.0078125, %v438_v44 }
 0x349   :  { %v440_v46 = vpop.xlane.xlu1 %439 }
 0x34a   :  { %v443_v47 = vmul.f32 0.0078125, %v440_v46  ;;  %v452_v49 = vmul.f32 %v442_v45, %v442_v45  ;;  %v456_v58 = vsub.f32 %v429_v39, %v442_v45 }
 0x34b   :  { %v447_v48 = vpop.xlane.xlu0 %446 }
 0x34c   :  { %v450_v50 = vmul.f32 0.0078125, %v447_v48  ;;  %v453_v52 = vmul.f32 %v443_v47, %v443_v47  ;;  %v457_v61 = vsub.f32 %v432_v41, %v443_v47 }
 0x34d   :  { %v449_v51 = vpop.xlane.xlu1 %448 }
 0x34e   :  { %v454_v53 = vsub.f32 %v450_v50, %v452_v49  ;;  %v451_v54 = vmul.f32 0.0078125, %v449_v51 }
 0x350   :  { %v458_v55 = vadd.f32 1e-05, %v454_v53  ;;  %v455_v56 = vsub.f32 %v451_v54, %v453_v52 }
 0x352   :  { %598 = vrsqrt.f32 %v458_v55  ;;  %v459_v57 = vadd.f32 1e-05, %v455_v56 }
 0x354   :  { %600 = vrsqrt.f32 %v459_v57 }
 0x35c   :  { %v599_v59 = vpop.eup %598 }
 0x35d   :  { %v462_v62 = vmul.f32 %v599_v59, %v456_v58 }
 0x35e   :  { %v601_v63 = vpop.eup %600 }
 0x35f   :  { %v468_v1 = vmul.f32 %v534_v60, %v462_v62  ;;  %v463_v2 = vmul.f32 %v601_v63, %v457_v61 }
 0x361   :  { %v474_v3 = vadd.f32 %v535_v0, %v468_v1  ;;  %v469_v4 = vmul.f32 %v534_v60, %v463_v2 }
 0x363   :  { %v476_v5 = vmul.f32 0.01, %v474_v3  ;;  %v475_v6 = vadd.f32 %v535_v0, %v469_v4 }
 0x365   :  { %v478_v8 = vmax.f32 %v474_v3, %v476_v5  ;;  %v477_v9 = vmul.f32 0.01, %v475_v6 }
 0x367   :  { %v486_v10 = vmul.f32 %v536_v7, %v478_v8  ;;  %v479_v11 = vmax.f32 %v475_v6, %v477_v9 }
 0x369   :  { %488 = vadd.xlane.f32.xlu0 %v486_v10  ;;  %v487_v13 = vmul.f32 %v536_v7, %v479_v11 }
 0x36b   :  { %490 = vadd.xlane.f32.xlu1 %v487_v13 }
 0x3f6   :  { %v489_v16 = vpop.xlane.xlu0 %488 }
 0x3f7   :  { %v496_v17 = vadd.f32 %v537_v15, %v489_v16 }
 0x3f8   :  { %v491_v18 = vpop.xlane.xlu1 %490 }
 0x3f9   :  { %499 = vst.msk [vmem:[%s862_s6] sm:$0xff] %vm498_vm2, %v496_v17  ;;  %v497_v19 = vadd.f32 %v537_v15, %v491_v18 }
 0x3fb   :  { %500 = vst.msk [vmem:[%s862_s6 + $0x8] sm:$0xff] %vm498_vm2, %v497_v19 }
 0x3fc   :  { %505 = vsyncpa [#allocation3], 1 }
 0x3fd   :  { %506 = vsyncpa [#allocation5], 1 }
 0x3fe   :  { %507 = vsyncpa [#allocation8], 1 }

</bundles_post_ra>
